<compile_context>
chip_gen: v6e
topology: v6e:2x2x1
jax: 0.10.0
libtpu: 0.0.40
codegen_flags: <defaults>
</compile_context>

<pallas_src>
import functools
import math

import jax
import jax.numpy as jnp
import numpy as np
from jax.experimental import pallas as pl
from jax.experimental.pallas import tpu as pltpu


def _cdiv(a, b):
    return -(-a // b)


def _power_kernel(x_ref, sel_ref, o_ref, *, length, lanes):
    # x_ref: (tm, lanes) folded input rows, sel_ref: (lanes, out_lanes)
    # constant selection/averaging matrix, o_ref: (tm, out_lanes).
    x = x_ref[...].astype(jnp.float32)
    x2 = x * x

    # Windowed sums along lanes via doubling rolls:
    #   partial[c][p] = sum_{j < c} x2[(p + j) mod lanes]
    # Wrap-around / cross-segment contamination only hits lanes that the
    # selection matrix below discards, so it is harmless.
    partial = {1: x2}
    c = 1
    while c * 2 <= length:
        partial[c * 2] = partial[c] + pltpu.roll(partial[c], shift=lanes - c, axis=1)
        c *= 2
    s = None
    off, rem, p = 0, length, c
    while rem > 0:
        if p <= rem:
            term = partial[p]
            if off:
                term = pltpu.roll(term, shift=lanes - off, axis=1)
            s = term if s is None else s + term
            off += p
            rem -= p
        p //= 2

    # Dense compaction of the window-start lanes into contiguous output lanes.
    # Single nonzero (= 1/length) per output column, so with the bf16-exact
    # hi/lo split the MXU result equals s[selected] / length exactly.
    s_hi = s.astype(jnp.bfloat16).astype(jnp.float32)
    s_lo = s - s_hi
    sel = sel_ref[...]
    pooled = (jnp.dot(s_hi, sel, preferred_element_type=jnp.float32)
              + jnp.dot(s_lo, sel, preferred_element_type=jnp.float32))

    o_ref[...] = jnp.log(pooled + 1e-07).astype(o_ref.dtype)


def power_layer(x, length, step):
    """x: (N, C, H, W) -> (N, C, H, W_out), W_out = (W - length)//step + 1."""
    N, C, H, W = x.shape
    assert W >= length, "pooling window larger than W"
    w_out = (W - length) // step + 1
    rows = N * C * H

    # Fold G rows per lane-dense super row (free contiguous reshape).
    G = 128 // math.gcd(W, 128)
    lanes = G * W
    out_lanes = G * w_out

    super_rows_raw = _cdiv(rows, G)

    # Row tile: large (per-grid-step overhead ~0.35us), multiple of 8 sublanes,
    # and keep >= 2 grid steps when possible so both v7x TensorCores get work.
    tm = min(1024, super_rows_raw)
    if super_rows_raw > 8:
        tm = min(tm, _cdiv(super_rows_raw, 2))
    tm = max(8, (tm // 8) * 8)

    super_rows = _cdiv(super_rows_raw, tm) * tm
    rows_p = super_rows * G

    x2d = x.reshape(rows, W)
    if rows_p != rows:
        # Zero padding -> pooled = log(1e-7), finite; sliced off below.
        x2d = jnp.pad(x2d, ((0, rows_p - rows), (0, 0)))
    x_folded = x2d.reshape(super_rows, lanes)

    # Constant selection/averaging matrix: picks lane seg*W + t*step into
    # output lane seg*w_out + t, scaled by 1/length.
    sel_np = np.zeros((lanes, out_lanes), dtype=np.float32)
    for seg in range(G):
        for t in range(w_out):
            sel_np[seg * W + t * step, seg * w_out + t] = 1.0 / float(length)
    sel = jnp.asarray(sel_np)

    kernel = functools.partial(_power_kernel, length=length, lanes=lanes)

    out_folded = pl.pallas_call(
        kernel,
        out_shape=jax.ShapeDtypeStruct((super_rows, out_lanes), x.dtype),
        grid_spec=pltpu.PrefetchScalarGridSpec(
            num_scalar_prefetch=0,
            grid=(super_rows // tm,),
            in_specs=[
                pl.BlockSpec((tm, lanes), lambda i: (i, 0)),
                # Whole (tiny) selection matrix, resident across grid steps.
                pl.BlockSpec((lanes, out_lanes), lambda i: (0, 0)),
            ],
            out_specs=pl.BlockSpec((tm, out_lanes), lambda i: (i, 0)),
        ),
        compiler_params=pltpu.CompilerParams(
            dimension_semantics=("parallel",)),
    )(x_folded, sel)

    out2d = out_folded.reshape(rows_p, w_out)[:rows]
    return out2d.reshape(N, C, H, w_out)


def power_layer_ref(x, length, step):
    """Pure-JAX reference matching torch.log(AvgPool2d(x**2) + eps)."""
    w_out = (x.shape[-1] - length) // step + 1
    x2 = x.astype(jnp.float32) ** 2
    cols = [jnp.mean(x2[..., t * step: t * step + length], axis=-1)
            for t in range(w_out)]
    return jnp.log(jnp.stack(cols, axis=-1) + 1e-07)


if __name__ == "__main__":
    # PowerLayer hyperparams (no learnable weights; `dim` unused in forward).
    dim, length, step = 2, 4, 2

    key = jax.random.PRNGKey(0)
    N, C, H, W = 2, 4, 16, 16
    x = jax.random.normal(key, (N, C, H, W), dtype=jnp.float32)

    y = power_layer(x, length, step)
    y = jax.block_until_ready(y)

    y_ref = power_layer_ref(x, length, step)
    assert y.shape == (N, C, H, (W - length) // step + 1), y.shape
    assert jnp.allclose(y, y_ref, atol=1e-5, rtol=1e-5), "mismatch vs reference"

    print("KERNEL_OK")
</pallas_src>

<mosaic_0001>
module attributes {stable_mosaic.version = 11 : i64} {
  func.func @_power_kernel(%arg0: i32, %arg1: memref<8x128xf32, #tpu.memory_space<vmem>>, %arg2: memref<128x56xf32, #tpu.memory_space<vmem>>, %arg3: memref<8x56xf32, #tpu.memory_space<vmem>>) attributes {dimension_semantics = [#tpu.dimension_semantics<parallel>], iteration_bounds = array<i64: 2>, scalar_prefetch = 0 : i64, scratch_operands = 0 : i64, tpu.core_type = #tpu.core_type<tc>, window_params = [{transform_indices = @transform_0, window_bounds = array<i64: 8, 128>}, {pipeline_mode = #tpu.pipeline_mode<synchronous>, transform_indices = @transform_1, window_bounds = array<i64: 128, 56>}, {transform_indices = @transform_2, window_bounds = array<i64: 8, 56>}]} {
    %c0 = arith.constant 0 : index
    %c0_0 = arith.constant 0 : index
    %0 = vector.load %arg1[%c0, %c0_0] : memref<8x128xf32, #tpu.memory_space<vmem>>, vector<8x128xf32>
    %1 = arith.mulf %0, %0 : vector<8x128xf32>
    %c127_i32 = arith.constant 127 : i32
    %2 = tpu.dynamic_rotate %1 by %c127_i32 dim 1 : vector<8x128xf32>, i32 -> vector<8x128xf32>
    %3 = arith.addf %1, %2 : vector<8x128xf32>
    %c126_i32 = arith.constant 126 : i32
    %4 = tpu.dynamic_rotate %3 by %c126_i32 dim 1 : vector<8x128xf32>, i32 -> vector<8x128xf32>
    %5 = arith.addf %3, %4 : vector<8x128xf32>
    %6 = arith.truncf %5 : vector<8x128xf32> to vector<8x128xbf16>
    %7 = arith.extf %6 : vector<8x128xbf16> to vector<8x128xf32>
    %8 = arith.subf %5, %7 : vector<8x128xf32>
    %c0_1 = arith.constant 0 : index
    %c0_2 = arith.constant 0 : index
    %9 = vector.load %arg2[%c0_1, %c0_2] : memref<128x56xf32, #tpu.memory_space<vmem>>, vector<128x56xf32>
    %cst = arith.constant dense<0.000000e+00> : vector<8x56xf32>
    %10 = tpu.matmul %7, %9, %cst {dimension_numbers = #tpu.dot_dimension_numbers<[1], [0], [0], [1], [0, 0, 1, 1], [], []>} : vector<8x128xf32>, vector<128x56xf32>, vector<8x56xf32> -> vector<8x56xf32>
    %cst_3 = arith.constant dense<0.000000e+00> : vector<8x56xf32>
    %11 = tpu.matmul %8, %9, %cst_3 {dimension_numbers = #tpu.dot_dimension_numbers<[1], [0], [0], [1], [0, 0, 1, 1], [], []>} : vector<8x128xf32>, vector<128x56xf32>, vector<8x56xf32> -> vector<8x56xf32>
    %12 = arith.addf %10, %11 : vector<8x56xf32>
    %cst_4 = arith.constant 1.000000e-07 : f32
    %13 = vector.broadcast %cst_4 : f32 to vector<8x56xf32>
    %14 = arith.addf %12, %13 : vector<8x56xf32>
    %15 = math.log %14 : vector<8x56xf32>
    %c0_5 = arith.constant 0 : index
    %c0_6 = arith.constant 0 : index
    %16 = vector.load %arg3[%c0_5, %c0_6] : memref<8x56xf32, #tpu.memory_space<vmem>>, vector<8x56xf32>
    tpu.vector_store %arg3[%c0_5, %c0_6], %15 {strides = array<i32>} : memref<8x56xf32, #tpu.memory_space<vmem>>, vector<8x56xf32>,
    return
  }
  func.func @transform_0(%arg0: i32) -> (i32, i32) {
    %c0_i32 = arith.constant 0 : i32
    %c0_i32_0 = arith.constant 0 : i32
    return %arg0, %c0_i32 : i32, i32
  }
  func.func @transform_1(%arg0: i32) -> (i32, i32) {
    %c0_i32 = arith.constant 0 : i32
    %c0_i32_0 = arith.constant 0 : i32
    %c0_i32_1 = arith.constant 0 : i32
    return %c0_i32, %c0_i32_0 : i32, i32
  }
  func.func @transform_2(%arg0: i32) -> (i32, i32) {
    %c0_i32 = arith.constant 0 : i32
    %c0_i32_0 = arith.constant 0 : i32
    return %arg0, %c0_i32 : i32, i32
  }
}

</mosaic_0001>

<bundles_post_ra>
// kernel: tpu_custom_call.1
= control target key start
LH: loop header
LB: loop body
LE: loop exit
PB: predicated region body
PF: predicated region fallthrough
CT: control target
= control target key end

     0   :  { %7 = vsyncpa [#allocation3], 0  ;;  %s798_s0 = inlined_call_operand.vmem [shape: f32[16,128], index: 0, kind: input, shape index: {}]   ;;  %s799_s1 = inlined_call_operand.vmem [shape: f32[128,56], index: 1, kind: input, shape index: {}]   ;;  %s800_s2 = inlined_call_operand.hbm [shape: f32[16,56], index: 2, kind: output, shape index: {}]  }
   0x1   :  { %9 = vsyncpa [#allocation3 + $0x1], 0  ;;  %s625_s9 = smov 0   ;;  %s627_s10 = smov 0  }
   0x2   :  { %s629_s11 = smov 0   ;;  %s631_s12 = smov 0  }
   0x3 LB: > { %s646_s13 = sadd.s32 4294967295, %s603_s12   ;;  %s384_s14 = sadd.s32 4294967294, %s603_s12   ;;  %s603_s12 = sphi %s631_s12, %s806_s12   ;;  %s599_s11 = sphi %s629_s11, %s805_s11   ;;  %s595_s10 = sphi %s627_s10, %s804_s10   ;;  %s591_s9 = sphi %s625_s9, %s803_s9  }
   0x4   : > { %s650_s15 = sadd.s32 1, %s603_s12   ;;  %s69_s16 = sadd.s32 1, %s599_s11 }
   0x5   : > { %s66_s17 = ssub.s32 %s603_s12, %s650_s15  ;;  %p79_p0 = scmp.ne.s32.totalorder %s599_s11, %s595_s10 }
   0x6   : > { %p67_p1 = scmp.eq.s32.totalorder %s66_s17, 0  ;;  %p80_p2 = scmp.eq.s32.totalorder %s646_s13, 1 }
   0x7   : > { %p85_p3 = scmp.ne.s32.totalorder %s595_s10, %s591_s9  ;;  %p86_p4 = scmp.eq.s32.totalorder %s384_s14, 1 }
   0x8   : > { %s661_s18 = scalar_select %p67_p1, %s599_s11, %s69_s16  }
   0x9   : > { %p663_p5 = por %p80_p2, %p79_p0  ;;  %p667_p6 = por %p86_p4, %p85_p3 }
   0xa   : > { %p387_p7 = scmp.ge.s32.totalorder %s603_s12, 1  ;;  %p114_p8 = scmp.lt.s32.totalorder %s603_s12, 3 }
   0xc   : > { %p115_p9 = pnand %p387_p7, %p114_p8 }
   0xd   : > { %p135_p10 = scmp.lt.s32.totalorder (!%p115_p9), %s646_s13, 1  ;;  %s606_s8 = smov (!%p115_p9), 127  }
   0xe   : > { %118 = sbr.rel (%p115_p9) target bundleno = 494 (0x1ee), region = 28  ;;  %s608_s21 = smov (!%p115_p9), 126  }
   0xf   : > { %s132_s22 = sand.u32 (!%p115_p9), 1, %s595_s10   ;;  %s391_s24 = sshll.u32 (!%p115_p9), %s646_s13, 7 }
  0x10   : > { %s388_s23 = sshll.u32 (!%p115_p9), %s132_s22, 3  ;;  %s323_s29 = scalar_lea.hbm (!%p115_p9), %s800_s2, %s391_s24 }
  0x11   : > { %s312_s30 = scalar_lea.sflag (!%p115_p9), [#allocation3], %s132_s22  ;;  %s609_s4 = smov (!%p115_p9), [#allocation2]  }
  0x12   : > { %s547_s5 = sshll.u32 (!%p115_p9), %s609_s4, 4  ;;  %s548_s5 = int_to_ptr.vmem [resolvable:$false] %s547_s5 }
  0x13   : > { %v165_v0 = vld [vmem:[%s799_s1 + $0x78] sm:$0xff]  ;;  %v605_v1 = vmov 0.0   ;;  %v164_v2 = vld [vmem:[%s799_s1 + $0x70] sm:$0xff]  ;;  %s136_s25 = scalar_select %p135_p10, %s646_s13, 1  ;;  %v163_v3 = vld [vmem:[%s799_s1 + $0x68] sm:$0xff]  ;;  %vm607_vm0 = vmmov 0  }
  0x14   : > { %463 = vmatprep.subr.mxu1 %v605_v1  ;;  %428 = vmatprep.subr.mxu0 %v605_v1  ;;  %v162_v4 = vld [vmem:[%s799_s1 + $0x60] sm:$0xff]  ;;  %v161_v7 = vld [vmem:[%s799_s1 + $0x58] sm:$0xff]  ;;  %v160_v8 = vld [vmem:[%s799_s1 + $0x50] sm:$0xff]  ;;  %vm309_vm1 = vcmask 457728   ;;  %s549_s13 = scalar_lea.vmem %s548_s5, 256 }
  0x15   : > { %464 = vmatpush3.msra.mxu1 %v165_v0  ;;  %429 = vmatpush3.msra.mxu0 %v165_v0  ;;  %s389_s28 = sshll.u32 %s136_s25, 3  ;;  %v159_v9 = vld [vmem:[%s799_s1 + $0x48] sm:$0xff]  ;;  %v158_v10 = vld [vmem:[%s799_s1 + $0x40] sm:$0xff]  ;;  %v157_v11 = vld [vmem:[%s799_s1 + $0x38] sm:$0xff]  ;;  %s134_s25 = scalar_lea.vmem [#allocation2], %s388_s23 }
  0x16   : > { %465 = vmatprep.subr.mxu1 %v605_v1  ;;  %430 = vmatprep.subr.mxu0 %v605_v1  ;;  %s138_s3 = scalar_lea.vmem %s798_s0, %s389_s28  ;;  %v156_v12 = vld [vmem:[%s799_s1 + $0x30] sm:$0xff]  ;;  %v155_v13 = vld [vmem:[%s799_s1 + $0x28] sm:$0xff]  ;;  %v154_v14 = vld [vmem:[%s799_s1 + $0x20] sm:$0xff]  ;;  %s325_s26 = sshll.u32 %s134_s25, 4  ;;  %s326_s26 = int_to_ptr.vmem [resolvable:$true] %s325_s26 }
  0x17   : > { %466 = vmatpush3.msra.mxu1 %v164_v2  ;;  %431 = vmatpush3.msra.mxu0 %v164_v2  ;;  %v139_v5 = vld [vmem:[%s138_s3] sm:$0xff]  ;;  %v153_v15 = vld [vmem:[%s799_s1 + $0x18] sm:$0xff]  ;;  %v152_v16 = vld [vmem:[%s799_s1 + $0x10] sm:$0xff]  ;;  %s543_s3 = scalar_lea.vmem %s326_s26, 128  ;;  %p550_p0 = scmp.lt.s32.totalorder %s326_s26, %s548_s5 }
  0x18   : > { %467 = vmatprep.subr.mxu1 %v605_v1  ;;  %432 = vmatprep.subr.mxu0 %v605_v1  ;;  %v696_v6 = vmul.f32 %v139_v5, %v139_v5  ;;  %v151_v17 = vld [vmem:[%s799_s1 + $0x8] sm:$0xff]  ;;  %v150_v18 = vld [vmem:[%s799_s1] sm:$0xff]  ;;  %p544_p11 = scmp.ne.s32.totalorder %s326_s26, %s543_s3  ;;  %p551_p1 = scmp.lt.s32.totalorder %s549_s13, %s543_s3 }
  0x19   : > { %468 = vmatpush3.msra.mxu1 %v163_v3  ;;  %433 = vmatpush3.msra.mxu0 %v163_v3 }
  0x1a   : > { %469 = vmatprep.subr.mxu1 %v605_v1  ;;  %434 = vmatprep.subr.mxu0 %v605_v1  ;;  %p545_p12 = pnand %p544_p11, %p663_p5  ;;  %p552_p2 = por %p551_p1, %p550_p0 }
  0x1b   : > { %470 = vmatpush3.msra.mxu1 %v162_v4  ;;  %435 = vmatpush3.msra.mxu0 %v162_v4 }
  0x1c   : > { %141 = vrot.lane.b32.xlu0 %v696_v6, %s606_s8  ;;  %471 = vmatprep.subr.mxu1 %v605_v1  ;;  %p546_p13 = pneg %p545_p12 }
  0x1d   : > { %472 = vmatpush3.msra.mxu1 %v161_v7  ;;  %436 = vmatprep.subr.mxu0 %v605_v1 }
  0x1e   : > { %473 = vmatprep.subr.mxu1 %v605_v1  ;;  %437 = vmatpush3.msra.mxu0 %v161_v7  ;;  %p553_p3 = pnand %p552_p2, %p546_p13 }
  0x1f   : > { %474 = vmatpush3.msra.mxu1 %v160_v8  ;;  %438 = vmatprep.subr.mxu0 %v605_v1 }
  0x20   : > { %475 = vmatprep.subr.mxu1 %v605_v1  ;;  %439 = vmatpush3.msra.mxu0 %v160_v8 }
  0x21   : > { %476 = vmatpush3.msra.mxu1 %v159_v9  ;;  %440 = vmatprep.subr.mxu0 %v605_v1 }
  0x22   : > { %477 = vmatprep.subr.mxu1 %v605_v1  ;;  %441 = vmatpush3.msra.mxu0 %v159_v9 }
  0x23   : > { %478 = vmatpush3.msra.mxu1 %v158_v10  ;;  %442 = vmatprep.subr.mxu0 %v605_v1 }
  0x24   : > { %479 = vmatprep.subr.mxu1 %v605_v1  ;;  %443 = vmatpush3.msra.mxu0 %v158_v10 }
  0x25   : > { %480 = vmatpush3.msra.mxu1 %v157_v11  ;;  %444 = vmatprep.subr.mxu0 %v605_v1 }
  0x26   : > { %481 = vmatprep.subr.mxu1 %v605_v1  ;;  %445 = vmatpush3.msra.mxu0 %v157_v11 }
  0x27   : > { %482 = vmatpush3.msra.mxu1 %v156_v12  ;;  %446 = vmatprep.subr.mxu0 %v605_v1 }
  0x28   : > { %483 = vmatprep.subr.mxu1 %v605_v1  ;;  %447 = vmatpush3.msra.mxu0 %v156_v12 }
  0x29   : > { %484 = vmatpush3.msra.mxu1 %v155_v13  ;;  %448 = vmatprep.subr.mxu0 %v605_v1 }
  0x2a   : > { %485 = vmatprep.subr.mxu1 %v605_v1  ;;  %449 = vmatpush3.msra.mxu0 %v155_v13 }
  0x2b   : > { %486 = vmatpush3.msra.mxu1 %v154_v14  ;;  %450 = vmatprep.subr.mxu0 %v605_v1 }
  0x2c   : > { %487 = vmatprep.subr.mxu1 %v605_v1  ;;  %451 = vmatpush3.msra.mxu0 %v154_v14 }
  0x2d   : > { %488 = vmatpush3.msra.mxu1 %v153_v15  ;;  %452 = vmatprep.subr.mxu0 %v605_v1 }
  0x2e   : > { %489 = vmatprep.subr.mxu1 %v605_v1  ;;  %453 = vmatpush3.msra.mxu0 %v153_v15 }
  0x2f   : > { %454 = vmatprep.subr.mxu0 %v605_v1  ;;  %490 = vmatpush3.msra.mxu1 %v152_v16 }
  0x30   : > { %455 = vmatpush3.msra.mxu0 %v152_v16  ;;  %491 = vmatprep.subr.mxu1 %v605_v1 }
  0x31   : > { %456 = vmatprep.subr.mxu0 %v605_v1  ;;  %492 = vmatpush3.msra.mxu1 %v151_v17 }
  0x32   : > { %457 = vmatpush3.msra.mxu0 %v151_v17  ;;  %493 = vmatprep.subr.mxu1 %v605_v1 }
  0x33   : > { %458 = vmatprep.subr.mxu0 %v605_v1  ;;  %494 = vmatpush3.msra.mxu1 %v150_v18 }
  0x34   : > { %495 = vmatprep.mubr.msk.f32.mxu1 %vm607_vm0, %v605_v1  ;;  %459 = vmatpush3.msra.mxu0 %v150_v18 }
  0x35   : > { %460 = vmatprep.mubr.msk.f32.mxu0 %vm607_vm0, %v605_v1 }
  0x8e   : > { %v142_v19 = vpop.permute.xlu0 %141 }
  0x8f   : > { %v143_v20 = vadd.f32 %v142_v19, %v696_v6 }
  0x91   : > { %144 = vrot.lane.b32.xlu0 %v143_v20, %s608_s21 }
 0x103   : > { %v145_v21 = vpop.permute.xlu0 %144 }
 0x104   : > { %v146_v22 = vadd.f32 %v145_v21, %v143_v20 }
 0x106   : > { %v147_v23 = vpack.c.bf16 %v146_v22, %v146_v22 }
 0x108   : > { %v148_v24 = vunpack.c.l.bf16 %v147_v23 }
 0x10a   : > { %v149_v25 = vsub.f32 %v146_v22, %v148_v24  ;;  %496 = vmatmul.mubr.f32.vlgmr.msra.gmra.mxu1 %v148_v24 }
 0x10c   : > { %461 = vmatmul.mubr.f32.vlgmr.msra.gmra.mxu0 %v149_v25 }
 0x1ca   : > { %v302_v26 = vpop.f32.mrf.mxu1 }
 0x1cc   : > { %v232_v27 = vpop.f32.mrf.mxu0  ;;  %v497_v28 = vpop.f32.mrf.mxu1 }
 0x1cd   : > { %v303_v29 = vadd.f32 %v302_v26, %v232_v27 }
 0x1ce   : > { %v462_v30 = vpop.f32.mrf.mxu0 }
 0x1cf   : > { %v306_v31 = vadd.f32 1e-07, %v303_v29 }
 0x1d1   : > { %541 = vlog2.f32 %v306_v31 }
 0x1de   : > { %v542_v32 = vpop.eup %541 }
 0x1df   : > { %v308_v33 = vmul.f32 0.6931472, %v542_v32 }
 0x1e1   : > { %310 = vst.msk [vmem:[%s134_s25] sm:$0xff] %vm309_vm1, %v308_v33 }
 0x1e2   : > { %556 = shalt.err (!%p553_p3)
}
 0x1e3   : > { %s557_s6 = scalar_lea.hbm %s323_s29, 128  ;;  %s561_s14 = scalar_lea.hbm %s800_s2, 256 }
 0x1e4   : > { %p558_p4 = scmp.ne.s32.totalorder %s323_s29, %s557_s6  ;;  %p562_p9 = scmp.lt.s32.totalorder %s323_s29, %s800_s2 }
 0x1e5   : > { %p563_p10 = scmp.lt.s32.totalorder %s561_s14, %s557_s6 }
 0x1e6   : > { %p559_p7 = pnand %p558_p4, %p663_p5 }
 0x1e7   : > { %p564_p11 = por %p563_p10, %p562_p9 }
 0x1e8   : > { %p560_p8 = pneg %p559_p7 }
 0x1ea   : > { %p565_p12 = pnand %p564_p11, %p560_p8 }
 0x1ec   : > { %568 = shalt.err (!%p565_p12)
}
 0x1ed   : > { %498 = dma.vmem_to_hbm [thread:$0]  (%p663_p5), %s326_s26, 128, %s323_s29, %s312_s30  }
 0x1ee PF: > { %p504_p13 = scmp.ge.s32.totalorder %s603_s12, 2  ;;  %s337_s21 = sand.u32 1, %s591_s9  }
 0x1ef   : > { %s338_s22 = scalar_lea.sflag [#allocation3], %s337_s21 }
 0x1f0   : > { %p501_p0 = pnand %p504_p13, %p667_p6 }
 0x1f2   : > { %p502_p1 = pneg %p501_p0 }
 0x1f4   : > { %586 = dma.done.wait (%p502_p1), %s338_s22, 128  }
 0x1f5   : > { %588 = vsyncadd (%p502_p1), %s338_s22, 4294967168  ;;  %p12_p2 = scmp.ge.s32.totalorder %s650_s15, 4   ;;  %s803_s9 = smov %s595_s10 }
 0x1f6   : > { %s804_s10 = smov %s599_s11  ;;  %s805_s11 = smov %s661_s18 }
 0x1f7   : > { %s806_s12 = smov %s650_s15  ;;  %14 = sbr.rel (!%p12_p2) target bundleno = 3 (0x3), region = 63 }
 0x1fc   :  { %343 = vsyncpa [#allocation3], 1 }
 0x1fd   :  { %345 = vsyncpa [#allocation3 + $0x1], 1 }

</bundles_post_ra>
